<compile_context>
chip_gen: v7x
topology: tpu7x:2x2x1
jax: 0.10.0
libtpu: 0.0.40
codegen_flags: <defaults>
</compile_context>

<pallas_src>
import functools

import jax
import jax.numpy as jnp
from jax.experimental import pallas as pl
from jax.experimental.pallas import tpu as pltpu


def _round_up(x, m):
    return (x + m - 1) // m * m


def _lstm_kernel(xg_ref,                 # (T, TB, 4H)  pre-gathered layer-0 input gates (bf16)
                 whh0_ref,               # (H, 4H)      layer-0 recurrent weights (bf16)
                 b0_ref,                 # (1, 4H)      layer-0 bias b_ih + b_hh  (f32)
                 w1_ref,                 # (2H, 4H)     fused [W_ih1; W_hh1]      (bf16)
                 b1_ref,                 # (1, 4H)      layer-1 bias              (f32)
                 wout_ref,               # (H, Vp)      output projection         (bf16)
                 bout_ref,               # (1, Vp)      output bias, zero-padded  (f32)
                 out_ref,                # (T, TB, Vp)  logits                    (f32)
                 h01, c0, c1, h1buf,     # VMEM scratch: (TB,2H),(TB,H),(TB,H) f32, (T,TB,H) bf16
                 *, hidden, t_chunk):
    H = hidden
    TB = h01.shape[0]
    cdt = whh0_ref.dtype                 # MXU compute dtype (bf16)

    # New batch block -> recurrence starts from zeros.
    @pl.when(pl.program_id(1) == 0)
    def _():
        h01[...] = jnp.zeros_like(h01)
        c0[...] = jnp.zeros_like(c0)
        c1[...] = jnp.zeros_like(c1)

    # Loop-invariant bias loads hoisted out of the recurrence (1 vreg each).
    b0 = b0_ref[...]
    b1 = b1_ref[...]

    def act(gates, c_prev):
        # PyTorch gate order: i, f, g, o.  Gate math stays f32 (VPU/EUP).
        i = jax.nn.sigmoid(gates[:, 0 * H:1 * H])
        f = jax.nn.sigmoid(gates[:, 1 * H:2 * H])
        g = jnp.tanh(gates[:, 2 * H:3 * H])
        o = jax.nn.sigmoid(gates[:, 3 * H:4 * H])
        c_new = f * c_prev + i * g
        h_new = o * jnp.tanh(c_new)
        return h_new, c_new

    @pl.loop(0, t_chunk)
    def _(tt):
        # ---- Layer 0: input contribution was gathered host-side, only the
        #      recurrent matmul remains on the sequential critical path.
        g0 = (xg_ref[tt].astype(jnp.float32)
              + jnp.dot(h01[:, 0:H].astype(cdt), whh0_ref[...],
                        preferred_element_type=jnp.float32)
              + b0)
        h0_new, c0_new = act(g0, c0[...])
        c0[...] = c0_new
        h01[:, 0:H] = h0_new          # h01 now holds [h0_t, h1_{t-1}]

        # ---- Layer 1: single fused MXU matmul against stacked [W_ih1; W_hh1].
        g1 = (jnp.dot(h01[...].astype(cdt), w1_ref[...],
                      preferred_element_type=jnp.float32)
              + b1)
        h1_new, c1_new = act(g1, c1[...])
        c1[...] = c1_new
        h01[:, H:2 * H] = h1_new

        # Stage h1 for the chunk-level output projection (off the critical path).
        h1buf[tt] = h1_new.astype(cdt)

    # ---- Output projection, batched over the whole time chunk: one big MXU
    #      matmul (T*TB rows amortize the W_out push) + one unmasked lane-dense
    #      slab store.
    h1_all = h1buf[...].reshape(t_chunk * TB, H)
    logits = (jnp.dot(h1_all, wout_ref[...], preferred_element_type=jnp.float32)
              + bout_ref[...])
    out_ref[...] = logits.reshape(t_chunk, TB, out_ref.shape[2]).astype(out_ref.dtype)


def text_generation_forward(x_idx, params, *, vocab_size, hidden,
                            t_chunk=32, batch_block=None):
    """x_idx: (seq_len, batch) int32 indices -> (batch, vocab, seq_len) f32 logits."""
    S, B = x_idx.shape
    V, H = vocab_size, hidden
    cdt = params["whh0_t"].dtype

    # Lane/sublane-aligned padded shapes.
    Bp = _round_up(B, 8)                      # f32 sublane alignment
    Vp = _round_up(V, 128)                    # lane-dense output stores
    T = max(1, min(t_chunk, S))               # timesteps per grid step
    Sp = _round_up(S, T)

    if batch_block is None:
        TB = Bp                               # single batch block
    else:
        TB = _round_up(min(batch_block, Bp), 8)
        Bp = _round_up(Bp, TB)
    n_b = Bp // TB
    n_t = Sp // T

    # Glue (host side): row gather replaces one_hot(x) @ W_ih0^T exactly.
    xg = jnp.take(params["wih0_t"], x_idx, axis=0)                 # (S, B, 4H) bf16
    xg = jnp.pad(xg, ((0, Sp - S), (0, Bp - B), (0, 0)))

    # Fuse layer-1 gate weights once; pad output projection to lane width.
    w1 = jnp.concatenate([params["wih1_t"], params["whh1_t"]], axis=0)   # (2H, 4H)
    wout = jnp.pad(params["wout_t"], ((0, 0), (0, Vp - V)))
    bout = jnp.pad(params["bout"], ((0, 0), (0, Vp - V)))

    kernel = functools.partial(_lstm_kernel, hidden=H, t_chunk=T)
    full = lambda b, t: (0, 0)                # weights resident across all grid steps

    # VMEM budget: resident weights (double-buffered by default) + chunked
    # activation blocks + scratch, with headroom; clamped for v7x's 64 MiB.
    w_itemsize = jnp.dtype(cdt).itemsize
    weight_bytes = ((H * 4 * H + 2 * H * 4 * H + H * Vp) * w_itemsize
                    + (4 * H + 4 * H + Vp) * 4)
    block_bytes = T * TB * 4 * H * w_itemsize + T * TB * Vp * 4
    scratch_bytes = 4 * TB * H * 4 + T * TB * H * w_itemsize
    vmem_limit = int(min(max(2 * (weight_bytes + block_bytes)
                             + scratch_bytes + (8 << 20), 32 << 20), 64 << 20))

    out_padded = pl.pallas_call(
        kernel,
        out_shape=jax.ShapeDtypeStruct((Sp, Bp, Vp), jnp.float32),
        grid_spec=pltpu.PrefetchScalarGridSpec(
            num_scalar_prefetch=0,
            grid=(n_b, n_t),                  # (batch blocks, time chunks)
            in_specs=[
                pl.BlockSpec((T, TB, 4 * H), lambda b, t: (t, b, 0)),  # x gates
                pl.BlockSpec((H, 4 * H), full),                        # W_hh0^T
                pl.BlockSpec((1, 4 * H), full),                        # b0
                pl.BlockSpec((2 * H, 4 * H), full),                    # [W_ih1; W_hh1]^T
                pl.BlockSpec((1, 4 * H), full),                        # b1
                pl.BlockSpec((H, Vp), full),                           # W_out^T (padded)
                pl.BlockSpec((1, Vp), full),                           # b_out   (padded)
            ],
            out_specs=pl.BlockSpec((T, TB, Vp), lambda b, t: (t, b, 0)),
            scratch_shapes=[pltpu.VMEM((TB, 2 * H), jnp.float32),      # [h0, h1]
                            pltpu.VMEM((TB, H), jnp.float32),          # c0
                            pltpu.VMEM((TB, H), jnp.float32),          # c1
                            pltpu.VMEM((T, TB, H), cdt)],              # staged h1
        ),
        compiler_params=pltpu.CompilerParams(
            dimension_semantics=("parallel", "arbitrary"),
            vmem_limit_bytes=vmem_limit),
    )(xg, params["whh0_t"], params["b0"], w1, params["b1"], wout, bout)

    # Glue: drop padding, then permute(1, 2, 0) -> (batch, vocab, seq_len).
    return jnp.transpose(out_padded[:S, :B, :V], (1, 2, 0))


def _reference_forward(x_idx, params, *, vocab_size, hidden):
    """Pure-JAX reference reproducing torch.nn.LSTM + Linear semantics
    (same bf16-weight / f32-accumulation arithmetic as the kernel)."""
    del vocab_size
    S, B = x_idx.shape
    H = hidden
    cdt = params["whh0_t"].dtype

    def cell(x_gates_f32, h, c, whh, b):
        g = (x_gates_f32
             + jnp.dot(h.astype(cdt), whh, preferred_element_type=jnp.float32)
             + b)
        i = jax.nn.sigmoid(g[:, 0 * H:1 * H])
        f = jax.nn.sigmoid(g[:, 1 * H:2 * H])
        gg = jnp.tanh(g[:, 2 * H:3 * H])
        o = jax.nn.sigmoid(g[:, 3 * H:4 * H])
        c = f * c + i * gg
        h = o * jnp.tanh(c)
        return h, c

    xg = jnp.take(params["wih0_t"], x_idx, axis=0)     # (S, B, 4H)

    def step(carry, xg_t):
        h0, c0, h1, c1 = carry
        h0, c0 = cell(xg_t.astype(jnp.float32), h0, c0,
                      params["whh0_t"], params["b0"])
        x1 = jnp.dot(h0.astype(cdt), params["wih1_t"],
                     preferred_element_type=jnp.float32)
        h1, c1 = cell(x1, h1, c1, params["whh1_t"], params["b1"])
        logits = (jnp.dot(h1.astype(cdt), params["wout_t"],
                          preferred_element_type=jnp.float32)
                  + params["bout"])
        return (h0, c0, h1, c1), logits

    z = jnp.zeros((B, H), jnp.float32)
    _, out = jax.lax.scan(step, (z, z, z, z), xg)      # (S, B, V)
    return jnp.transpose(out, (1, 2, 0))


def init_params(key, vocab_size, hidden, dtype=jnp.bfloat16):
    """Deterministic synthetic parameters (PyTorch-style uniform init).

    Weights are stored pre-transposed (x @ W^T form) in the MXU compute dtype
    (bf16); biases stay f32 (b_ih + b_hh folded)."""
    V, H = vocab_size, hidden
    k = 1.0 / jnp.sqrt(jnp.float32(H))
    keys = jax.random.split(key, 10)
    u = lambda kk, shape: jax.random.uniform(kk, shape, jnp.float32, -k, k)
    return {
        "wih0_t": u(keys[0], (V, 4 * H)).astype(dtype),
        "whh0_t": u(keys[1], (H, 4 * H)).astype(dtype),
        "b0":     u(keys[2], (1, 4 * H)) + u(keys[3], (1, 4 * H)),
        "wih1_t": u(keys[4], (H, 4 * H)).astype(dtype),
        "whh1_t": u(keys[5], (H, 4 * H)).astype(dtype),
        "b1":     u(keys[6], (1, 4 * H)) + u(keys[7], (1, 4 * H)),
        "wout_t": u(keys[8], (H, V)).astype(dtype),
        "bout":   u(keys[9], (1, V)),
    }


if __name__ == "__main__":
    VOCAB = 32      # vocab_size
    HIDDEN = 32     # lstm_num_hidden (small demo; module default 256 is 128-aligned)
    SEQ = 8
    BATCH = 2

    root = jax.random.PRNGKey(0)
    k_params, k_x = jax.random.split(root)
    params = init_params(k_params, VOCAB, HIDDEN)

    # Input: (seq_len, batch) word indices.
    x_idx = jax.random.randint(k_x, (SEQ, BATCH), 0, VOCAB, dtype=jnp.int32)

    out = text_generation_forward(x_idx, params, vocab_size=VOCAB, hidden=HIDDEN)
    out = jax.block_until_ready(out)
    assert out.shape == (BATCH, VOCAB, SEQ), out.shape

    ref = _reference_forward(x_idx, params, vocab_size=VOCAB, hidden=HIDDEN)
    ref = jax.block_until_ready(ref)
    # bf16 matmul operands (f32 accumulation) => tolerance loosened vs pure f32.
    assert jnp.allclose(out, ref, atol=5e-2, rtol=5e-2), (
        float(jnp.max(jnp.abs(out - ref))))

    # TODO(synk): the module's sample() (autoregressive greedy/multinomial decode)
    # is host-driven control flow and is not implemented as a kernel.
    print("KERNEL_OK")
</pallas_src>

<mosaic_0001>
module attributes {stable_mosaic.version = 11 : i64} {
  func.func @_lstm_kernel(%arg0: i32, %arg1: i32, %arg2: memref<8x8x128xbf16, #tpu.memory_space<vmem>>, %arg3: memref<32x128xbf16, #tpu.memory_space<vmem>>, %arg4: memref<1x128xf32, #tpu.memory_space<vmem>>, %arg5: memref<64x128xbf16, #tpu.memory_space<vmem>>, %arg6: memref<1x128xf32, #tpu.memory_space<vmem>>, %arg7: memref<32x128xbf16, #tpu.memory_space<vmem>>, %arg8: memref<1x128xf32, #tpu.memory_space<vmem>>, %arg9: memref<8x8x128xf32, #tpu.memory_space<vmem>>, %arg10: memref<8x64xf32, #tpu.memory_space<vmem>>, %arg11: memref<8x32xf32, #tpu.memory_space<vmem>>, %arg12: memref<8x32xf32, #tpu.memory_space<vmem>>, %arg13: memref<8x8x32xbf16, #tpu.memory_space<vmem>>) attributes {dimension_semantics = [#tpu.dimension_semantics<parallel>, #tpu.dimension_semantics<arbitrary>], iteration_bounds = array<i64: 1, 1>, scalar_prefetch = 0 : i64, scratch_operands = 4 : i64, tpu.core_type = #tpu.core_type<tc>, window_params = [{transform_indices = @transform_0, window_bounds = array<i64: 8, 8, 128>}, {pipeline_mode = #tpu.pipeline_mode<synchronous>, transform_indices = @transform_1, window_bounds = array<i64: 32, 128>}, {pipeline_mode = #tpu.pipeline_mode<synchronous>, transform_indices = @transform_2, window_bounds = array<i64: 1, 128>}, {pipeline_mode = #tpu.pipeline_mode<synchronous>, transform_indices = @transform_3, window_bounds = array<i64: 64, 128>}, {pipeline_mode = #tpu.pipeline_mode<synchronous>, transform_indices = @transform_4, window_bounds = array<i64: 1, 128>}, {pipeline_mode = #tpu.pipeline_mode<synchronous>, transform_indices = @transform_5, window_bounds = array<i64: 32, 128>}, {pipeline_mode = #tpu.pipeline_mode<synchronous>, transform_indices = @transform_6, window_bounds = array<i64: 1, 128>}, {transform_indices = @transform_7, window_bounds = array<i64: 8, 8, 128>}]} {
    %c0_i32 = arith.constant 0 : i32
    %0 = arith.cmpi eq, %arg1, %c0_i32 : i32
    %1 = arith.extui %0 : i1 to i32
    %c0_i32_0 = arith.constant 0 : i32
    %2 = arith.cmpi ne, %1, %c0_i32_0 : i32
    scf.if %2 {
      %cst_16 = arith.constant 0.000000e+00 : f32
      %15 = vector.broadcast %cst_16 : f32 to vector<8x64xf32>
      %c0_17 = arith.constant 0 : index
      %c0_18 = arith.constant 0 : index
      %16 = vector.load %arg10[%c0_17, %c0_18] : memref<8x64xf32, #tpu.memory_space<vmem>>, vector<8x64xf32>
      tpu.vector_store %arg10[%c0_17, %c0_18], %15 {strides = array<i32>} : memref<8x64xf32, #tpu.memory_space<vmem>>, vector<8x64xf32>,
      %cst_19 = arith.constant 0.000000e+00 : f32
      %17 = vector.broadcast %cst_19 : f32 to vector<8x32xf32>
      %c0_20 = arith.constant 0 : index
      %c0_21 = arith.constant 0 : index
      %18 = vector.load %arg11[%c0_20, %c0_21] : memref<8x32xf32, #tpu.memory_space<vmem>>, vector<8x32xf32>
      tpu.vector_store %arg11[%c0_20, %c0_21], %17 {strides = array<i32>} : memref<8x32xf32, #tpu.memory_space<vmem>>, vector<8x32xf32>,
      %cst_22 = arith.constant 0.000000e+00 : f32
      %19 = vector.broadcast %cst_22 : f32 to vector<8x32xf32>
      %c0_23 = arith.constant 0 : index
      %c0_24 = arith.constant 0 : index
      %20 = vector.load %arg12[%c0_23, %c0_24] : memref<8x32xf32, #tpu.memory_space<vmem>>, vector<8x32xf32>
      tpu.vector_store %arg12[%c0_23, %c0_24], %19 {strides = array<i32>} : memref<8x32xf32, #tpu.memory_space<vmem>>, vector<8x32xf32>,
    } else {
    }
    %c0 = arith.constant 0 : index
    %c0_1 = arith.constant 0 : index
    %3 = vector.load %arg4[%c0, %c0_1] : memref<1x128xf32, #tpu.memory_space<vmem>>, vector<1x128xf32>
    %c0_2 = arith.constant 0 : index
    %c0_3 = arith.constant 0 : index
    %4 = vector.load %arg6[%c0_2, %c0_3] : memref<1x128xf32, #tpu.memory_space<vmem>>, vector<1x128xf32>
    %c0_i32_4 = arith.constant 0 : i32
    %c8_i32 = arith.constant 8 : i32
    %5 = arith.addi %c0_i32_4, %c8_i32 : i32
    %c1_i32 = arith.constant 1 : i32
    scf.for %arg14 = %c0_i32_4 to %5 step %c1_i32  : i32 {
      %c1_i32_16 = arith.constant 1 : i32
      %15 = arith.muli %arg14, %c1_i32_16 : i32
      %c0_i32_17 = arith.constant 0 : i32
      %16 = arith.addi %c0_i32_17, %15 : i32
      %17 = arith.index_cast %16 : i32 to index
      %c0_18 = arith.constant 0 : index
      %c0_19 = arith.constant 0 : index
      %18 = vector.load %arg2[%17, %c0_18, %c0_19] : memref<8x8x128xbf16, #tpu.memory_space<vmem>>, vector<1x8x128xbf16>
      %19 = vector.shape_cast %18 : vector<1x8x128xbf16> to vector<8x128xbf16>
      %20 = arith.extf %19 : vector<8x128xbf16> to vector<8x128xf32>
      %c0_20 = arith.constant 0 : index
      %c0_21 = arith.constant 0 : index
      %21 = vector.load %arg10[%c0_20, %c0_21] : memref<8x64xf32, #tpu.memory_space<vmem>>, vector<8x32xf32>
      %22 = arith.truncf %21 : vector<8x32xf32> to vector<8x32xbf16>
      %c0_22 = arith.constant 0 : index
      %c0_23 = arith.constant 0 : index
      %23 = vector.load %arg3[%c0_22, %c0_23] : memref<32x128xbf16, #tpu.memory_space<vmem>>, vector<32x128xbf16>
      %cst_24 = arith.constant dense<0.000000e+00> : vector<8x128xf32>
      %24 = tpu.matmul %22, %23, %cst_24 {dimension_numbers = #tpu.dot_dimension_numbers<[1], [0], [0], [1], [0, 0, 1, 1], [], []>} : vector<8x32xbf16>, vector<32x128xbf16>, vector<8x128xf32> -> vector<8x128xf32>
      %25 = arith.addf %20, %24 : vector<8x128xf32>
      %26 = vector.broadcast %3 : vector<1x128xf32> to vector<8x128xf32>
      %27 = arith.addf %25, %26 : vector<8x128xf32>
      %c0_25 = arith.constant 0 : index
      %c0_26 = arith.constant 0 : index
      %28 = vector.load %arg11[%c0_25, %c0_26] : memref<8x32xf32, #tpu.memory_space<vmem>>, vector<8x32xf32>
      %29 = vector.extract_strided_slice %27 {offsets = [0, 0], sizes = [8, 32], strides = [1, 1]} : vector<8x128xf32> to vector<8x32xf32>
      %30 = arith.negf %29 : vector<8x32xf32>
      %31 = math.exp %30 : vector<8x32xf32>
      %cst_27 = arith.constant 1.000000e+00 : f32
      %32 = vector.broadcast %cst_27 : f32 to vector<8x32xf32>
      %33 = arith.addf %32, %31 : vector<8x32xf32>
      %34 = arith.divf %32, %33 : vector<8x32xf32>
      %35 = vector.extract_strided_slice %27 {offsets = [0, 32], sizes = [8, 32], strides = [1, 1]} : vector<8x128xf32> to vector<8x32xf32>
      %36 = arith.negf %35 : vector<8x32xf32>
      %37 = math.exp %36 : vector<8x32xf32>
      %cst_28 = arith.constant 1.000000e+00 : f32
      %38 = vector.broadcast %cst_28 : f32 to vector<8x32xf32>
      %39 = arith.addf %38, %37 : vector<8x32xf32>
      %40 = arith.divf %38, %39 : vector<8x32xf32>
      %41 = vector.extract_strided_slice %27 {offsets = [0, 64], sizes = [8, 32], strides = [1, 1]} : vector<8x128xf32> to vector<8x32xf32>
      %42 = math.tanh %41 : vector<8x32xf32>
      %43 = vector.extract_strided_slice %27 {offsets = [0, 96], sizes = [8, 32], strides = [1, 1]} : vector<8x128xf32> to vector<8x32xf32>
      %44 = arith.negf %43 : vector<8x32xf32>
      %45 = math.exp %44 : vector<8x32xf32>
      %cst_29 = arith.constant 1.000000e+00 : f32
      %46 = vector.broadcast %cst_29 : f32 to vector<8x32xf32>
      %47 = arith.addf %46, %45 : vector<8x32xf32>
      %48 = arith.divf %46, %47 : vector<8x32xf32>
      %49 = arith.mulf %40, %28 : vector<8x32xf32>
      %50 = arith.mulf %34, %42 : vector<8x32xf32>
      %51 = arith.addf %49, %50 : vector<8x32xf32>
      %52 = math.tanh %51 : vector<8x32xf32>
      %53 = arith.mulf %48, %52 : vector<8x32xf32>
      %c0_30 = arith.constant 0 : index
      %c0_31 = arith.constant 0 : index
      %54 = vector.load %arg11[%c0_30, %c0_31] : memref<8x32xf32, #tpu.memory_space<vmem>>, vector<8x32xf32>
      tpu.vector_store %arg11[%c0_30, %c0_31], %51 {strides = array<i32>} : memref<8x32xf32, #tpu.memory_space<vmem>>, vector<8x32xf32>,
      %c0_32 = arith.constant 0 : index
      %c0_33 = arith.constant 0 : index
      %55 = vector.load %arg10[%c0_32, %c0_33] : memref<8x64xf32, #tpu.memory_space<vmem>>, vector<8x32xf32>
      tpu.vector_store %arg10[%c0_32, %c0_33], %53 {strides = array<i32>} : memref<8x64xf32, #tpu.memory_space<vmem>>, vector<8x32xf32>,
      %c0_34 = arith.constant 0 : index
      %c0_35 = arith.constant 0 : index
      %56 = vector.load %arg10[%c0_34, %c0_35] : memref<8x64xf32, #tpu.memory_space<vmem>>, vector<8x64xf32>
      %57 = arith.truncf %56 : vector<8x64xf32> to vector<8x64xbf16>
      %c0_36 = arith.constant 0 : index
      %c0_37 = arith.constant 0 : index
      %58 = vector.load %arg5[%c0_36, %c0_37] : memref<64x128xbf16, #tpu.memory_space<vmem>>, vector<64x128xbf16>
      %cst_38 = arith.constant dense<0.000000e+00> : vector<8x128xf32>
      %59 = tpu.matmul %57, %58, %cst_38 {dimension_numbers = #tpu.dot_dimension_numbers<[1], [0], [0], [1], [0, 0, 1, 1], [], []>} : vector<8x64xbf16>, vector<64x128xbf16>, vector<8x128xf32> -> vector<8x128xf32>
      %60 = vector.broadcast %4 : vector<1x128xf32> to vector<8x128xf32>
      %61 = arith.addf %59, %60 : vector<8x128xf32>
      %c0_39 = arith.constant 0 : index
      %c0_40 = arith.constant 0 : index
      %62 = vector.load %arg12[%c0_39, %c0_40] : memref<8x32xf32, #tpu.memory_space<vmem>>, vector<8x32xf32>
      %63 = vector.extract_strided_slice %61 {offsets = [0, 0], sizes = [8, 32], strides = [1, 1]} : vector<8x128xf32> to vector<8x32xf32>
      %64 = arith.negf %63 : vector<8x32xf32>
      %65 = math.exp %64 : vector<8x32xf32>
      %cst_41 = arith.constant 1.000000e+00 : f32
      %66 = vector.broadcast %cst_41 : f32 to vector<8x32xf32>
      %67 = arith.addf %66, %65 : vector<8x32xf32>
      %68 = arith.divf %66, %67 : vector<8x32xf32>
      %69 = vector.extract_strided_slice %61 {offsets = [0, 32], sizes = [8, 32], strides = [1, 1]} : vector<8x128xf32> to vector<8x32xf32>
      %70 = arith.negf %69 : vector<8x32xf32>
      %71 = math.exp %70 : vector<8x32xf32>
      %cst_42 = arith.constant 1.000000e+00 : f32
      %72 = vector.broadcast %cst_42 : f32 to vector<8x32xf32>
      %73 = arith.addf %72, %71 : vector<8x32xf32>
      %74 = arith.divf %72, %73 : vector<8x32xf32>
      %75 = vector.extract_strided_slice %61 {offsets = [0, 64], sizes = [8, 32], strides = [1, 1]} : vector<8x128xf32> to vector<8x32xf32>
      %76 = math.tanh %75 : vector<8x32xf32>
      %77 = vector.extract_strided_slice %61 {offsets = [0, 96], sizes = [8, 32], strides = [1, 1]} : vector<8x128xf32> to vector<8x32xf32>
      %78 = arith.negf %77 : vector<8x32xf32>
      %79 = math.exp %78 : vector<8x32xf32>
      %cst_43 = arith.constant 1.000000e+00 : f32
      %80 = vector.broadcast %cst_43 : f32 to vector<8x32xf32>
      %81 = arith.addf %80, %79 : vector<8x32xf32>
      %82 = arith.divf %80, %81 : vector<8x32xf32>
      %83 = arith.mulf %74, %62 : vector<8x32xf32>
      %84 = arith.mulf %68, %76 : vector<8x32xf32>
      %85 = arith.addf %83, %84 : vector<8x32xf32>
      %86 = math.tanh %85 : vector<8x32xf32>
      %87 = arith.mulf %82, %86 : vector<8x32xf32>
      %c0_44 = arith.constant 0 : index
      %c0_45 = arith.constant 0 : index
      %88 = vector.load %arg12[%c0_44, %c0_45] : memref<8x32xf32, #tpu.memory_space<vmem>>, vector<8x32xf32>
      tpu.vector_store %arg12[%c0_44, %c0_45], %85 {strides = array<i32>} : memref<8x32xf32, #tpu.memory_space<vmem>>, vector<8x32xf32>,
      %c0_46 = arith.constant 0 : index
      %c32 = arith.constant 32 : index
      %89 = vector.load %arg10[%c0_46, %c32] : memref<8x64xf32, #tpu.memory_space<vmem>>, vector<8x32xf32>
      tpu.vector_store %arg10[%c0_46, %c32], %87 {strides = array<i32>} : memref<8x64xf32, #tpu.memory_space<vmem>>, vector<8x32xf32>,
      %90 = arith.truncf %87 : vector<8x32xf32> to vector<8x32xbf16>
      %91 = arith.index_cast %16 : i32 to index
      %c0_47 = arith.constant 0 : index
      %c0_48 = arith.constant 0 : index
      %92 = vector.load %arg13[%91, %c0_47, %c0_48] : memref<8x8x32xbf16, #tpu.memory_space<vmem>>, vector<1x8x32xbf16>
      %93 = vector.shape_cast %92 : vector<1x8x32xbf16> to vector<8x32xbf16>
      %94 = vector.shape_cast %90 : vector<8x32xbf16> to vector<1x8x32xbf16>
      tpu.vector_store %arg13[%91, %c0_47, %c0_48], %94 {strides = array<i32>} : memref<8x8x32xbf16, #tpu.memory_space<vmem>>, vector<1x8x32xbf16>,
    }
    %c8_i32_5 = arith.constant 8 : i32
    %c0_6 = arith.constant 0 : index
    %c0_7 = arith.constant 0 : index
    %c0_8 = arith.constant 0 : index
    %6 = vector.load %arg13[%c0_6, %c0_7, %c0_8] : memref<8x8x32xbf16, #tpu.memory_space<vmem>>, vector<8x8x32xbf16>
    %7 = vector.shape_cast %6 : vector<8x8x32xbf16> to vector<64x32xbf16>
    %c0_9 = arith.constant 0 : index
    %c0_10 = arith.constant 0 : index
    %8 = vector.load %arg7[%c0_9, %c0_10] : memref<32x128xbf16, #tpu.memory_space<vmem>>, vector<32x128xbf16>
    %cst = arith.constant dense<0.000000e+00> : vector<64x128xf32>
    %9 = tpu.matmul %7, %8, %cst {dimension_numbers = #tpu.dot_dimension_numbers<[1], [0], [0], [1], [0, 0, 1, 1], [], []>} : vector<64x32xbf16>, vector<32x128xbf16>, vector<64x128xf32> -> vector<64x128xf32>
    %c0_11 = arith.constant 0 : index
    %c0_12 = arith.constant 0 : index
    %10 = vector.load %arg8[%c0_11, %c0_12] : memref<1x128xf32, #tpu.memory_space<vmem>>, vector<1x128xf32>
    %11 = vector.broadcast %10 : vector<1x128xf32> to vector<64x128xf32>
    %12 = arith.addf %9, %11 : vector<64x128xf32>
    %13 = vector.shape_cast %12 : vector<64x128xf32> to vector<8x8x128xf32>
    %c0_13 = arith.constant 0 : index
    %c0_14 = arith.constant 0 : index
    %c0_15 = arith.constant 0 : index
    %14 = vector.load %arg9[%c0_13, %c0_14, %c0_15] : memref<8x8x128xf32, #tpu.memory_space<vmem>>, vector<8x8x128xf32>
    tpu.vector_store %arg9[%c0_13, %c0_14, %c0_15], %13 {strides = array<i32>} : memref<8x8x128xf32, #tpu.memory_space<vmem>>, vector<8x8x128xf32>,
    return
  }
  func.func @transform_0(%arg0: i32, %arg1: i32) -> (i32, i32, i32) {
    %c0_i32 = arith.constant 0 : i32
    %c0_i32_0 = arith.constant 0 : i32
    return %arg1, %arg0, %c0_i32 : i32, i32, i32
  }
  func.func @transform_1(%arg0: i32, %arg1: i32) -> (i32, i32) {
    %c0_i32 = arith.constant 0 : i32
    %c0_i32_0 = arith.constant 0 : i32
    %c0_i32_1 = arith.constant 0 : i32
    return %c0_i32, %c0_i32_0 : i32, i32
  }
  func.func @transform_2(%arg0: i32, %arg1: i32) -> (i32, i32) {
    %c0_i32 = arith.constant 0 : i32
    %c0_i32_0 = arith.constant 0 : i32
    %c0_i32_1 = arith.constant 0 : i32
    return %c0_i32, %c0_i32_0 : i32, i32
  }
  func.func @transform_3(%arg0: i32, %arg1: i32) -> (i32, i32) {
    %c0_i32 = arith.constant 0 : i32
    %c0_i32_0 = arith.constant 0 : i32
    %c0_i32_1 = arith.constant 0 : i32
    return %c0_i32, %c0_i32_0 : i32, i32
  }
  func.func @transform_4(%arg0: i32, %arg1: i32) -> (i32, i32) {
    %c0_i32 = arith.constant 0 : i32
    %c0_i32_0 = arith.constant 0 : i32
    %c0_i32_1 = arith.constant 0 : i32
    return %c0_i32, %c0_i32_0 : i32, i32
  }
  func.func @transform_5(%arg0: i32, %arg1: i32) -> (i32, i32) {
    %c0_i32 = arith.constant 0 : i32
    %c0_i32_0 = arith.constant 0 : i32
    %c0_i32_1 = arith.constant 0 : i32
    return %c0_i32, %c0_i32_0 : i32, i32
  }
  func.func @transform_6(%arg0: i32, %arg1: i32) -> (i32, i32) {
    %c0_i32 = arith.constant 0 : i32
    %c0_i32_0 = arith.constant 0 : i32
    %c0_i32_1 = arith.constant 0 : i32
    return %c0_i32, %c0_i32_0 : i32, i32
  }
  func.func @transform_7(%arg0: i32, %arg1: i32) -> (i32, i32, i32) {
    %c0_i32 = arith.constant 0 : i32
    %c0_i32_0 = arith.constant 0 : i32
    return %arg1, %arg0, %c0_i32 : i32, i32, i32
  }
}

</mosaic_0001>

<bundles_post_ra>
// kernel: tpu_custom_call.1
= control target key start
LH: loop header
LB: loop body
LE: loop exit
PB: predicated region body
PF: predicated region fallthrough
CT: control target
= control target key end

     0   :  { %12 = vsyncpa [#allocation7], 0  ;;  %s902_s0 = inlined_call_operand.hbm [shape: bf16[8,8,128], index: 0, kind: input, shape index: {}]   ;;  %s903_s1 = inlined_call_operand.hbm [shape: bf16[32,128], index: 1, kind: input, shape index: {}]   ;;  %s904_s2 = inlined_call_operand.vmem [shape: f32[1,128], index: 2, kind: input, shape index: {}]   ;;  %s905_s3 = inlined_call_operand.hbm [shape: bf16[64,128], index: 3, kind: input, shape index: {}]   ;;  %s906_s4 = inlined_call_operand.vmem [shape: f32[1,128], index: 4, kind: input, shape index: {}]   ;;  %s907_s5 = inlined_call_operand.vmem [shape: bf16[32,128], index: 5, kind: input, shape index: {}]   ;;  %s908_s6 = inlined_call_operand.vmem [shape: f32[1,128], index: 6, kind: input, shape index: {}]   ;;  %s909_s7 = inlined_call_operand.hbm [shape: f32[8,8,128], index: 7, kind: output, shape index: {}]  }
   0x1   :  { %13 = vsyncpa [#allocation10], 0 }
   0x2   :  { %14 = vsyncpa [#allocation8], 0  ;;  %s727_s24 = smov [#allocation9]   ;;  %s728_s26 = smov [#allocation6]  }
   0x3   :  { %s32_s25 = sshll.u32 %s727_s24, 4  ;;  %s20_s27 = sshll.u32 %s728_s26, 4  ;;  %s33_s25 = int_to_ptr.vmem [resolvable:$true] %s32_s25  ;;  %s781_s27 = int_to_ptr.vmem [resolvable:$true] %s20_s27 }
   0x4   :  { %s625_s30 = scalar_lea.hbm %s903_s1, 256 }
   0x5   :  { %p626_p0 = scmp.ne.s32.totalorder %s903_s1, %s625_s30  ;;  %p629_p1 = scmp.lt.u32.totalorder %s625_s30, %s903_s1 }
   0x7   :  { %p631_p2 = pnand %p629_p1, %p626_p0 }
   0x9   :  { %634 = shalt.err (!%p631_p2)
}
   0xa   :  { %s635_s12 = scalar_lea.vmem %s33_s25, 256  ;;  %p640_p4 = scmp.lt.s32.totalorder %s33_s25, %s33_s25 }
   0xb   :  { %p636_p3 = scmp.ne.s32.totalorder %s33_s25, %s635_s12  ;;  %p641_p5 = scmp.lt.s32.totalorder %s635_s12, %s635_s12 }
   0xd   :  { %p642_p6 = por %p641_p5, %p640_p4 }
   0xf   :  { %p643_p7 = pnand %p642_p6, %p636_p3 }
  0x11   :  { %646 = shalt.err (!%p643_p7)
}
  0x12   :  { %s729_s13 = smov 64   ;;  %s730_s14 = smov 4  }
  0x13   :  { %38 = dma.hbm_to_vmem [thread:$0]  %s903_s1, 256, %s33_s25, [#allocation10], %s729_s13, %s729_s13, %s730_s14  }
  0x14   :  { %s647_s19 = scalar_lea.hbm %s902_s0, 512 }
  0x15   :  { %p648_p8 = scmp.ne.s32.totalorder %s902_s0, %s647_s19  ;;  %p651_p9 = scmp.lt.u32.totalorder %s647_s19, %s902_s0 }
  0x17   :  { %p653_p10 = pnand %p651_p9, %p648_p8 }
  0x19   :  { %656 = shalt.err (!%p653_p10)
}
  0x1a   :  { %s657_s24 = scalar_lea.vmem %s781_s27, 512  ;;  %p662_p12 = scmp.lt.s32.totalorder %s781_s27, %s781_s27 }
  0x1b   :  { %p658_p11 = scmp.ne.s32.totalorder %s781_s27, %s657_s24  ;;  %p663_p13 = scmp.lt.s32.totalorder %s657_s24, %s657_s24 }
  0x1d   :  { %p664_p0 = por %p663_p13, %p662_p12 }
  0x1f   :  { %p665_p1 = pnand %p664_p0, %p658_p11 }
  0x21   :  { %668 = shalt.err (!%p665_p1)
}
  0x22   :  { %26 = dma.hbm_to_vmem [thread:$0]  %s902_s0, 512, %s781_s27, [#allocation7], %s729_s13, %s729_s13, %s730_s14  }
  0x23   :  { %s731_s26 = smov [#allocation11]   ;;  %s669_s8 = scalar_lea.hbm %s905_s3, 512 }
  0x24   :  { %s46_s28 = sshll.u32 %s731_s26, 4  ;;  %p670_p2 = scmp.ne.s32.totalorder %s905_s3, %s669_s8  ;;  %s47_s28 = int_to_ptr.vmem [resolvable:$true] %s46_s28 }
  0x25   :  { %p673_p3 = scmp.lt.u32.totalorder %s669_s8, %s905_s3 }
  0x27   :  { %p675_p4 = pnand %p673_p3, %p670_p2 }
  0x29   :  { %678 = shalt.err (!%p675_p4)
}
  0x2a   :  { %s679_s15 = scalar_lea.vmem %s47_s28, 512  ;;  %p684_p6 = scmp.lt.s32.totalorder %s47_s28, %s47_s28 }
  0x2b   :  { %p680_p5 = scmp.ne.s32.totalorder %s47_s28, %s679_s15  ;;  %p685_p7 = scmp.lt.s32.totalorder %s679_s15, %s679_s15 }
  0x2d   :  { %p686_p8 = por %p685_p7, %p684_p6 }
  0x2f   :  { %p687_p9 = pnand %p686_p8, %p680_p5 }
  0x31   :  { %690 = shalt.err (!%p687_p9)
}
  0x32   :  { %52 = dma.hbm_to_vmem [thread:$0]  %s905_s3, 512, %s47_s28, [#allocation10], %s729_s13, %s729_s13, %s730_s14  }
  0x33   :  { %717 = dma.done.wait [#allocation7], 512  }
  0x34   :  { %718 = vsyncadd [#allocation7], 4294966784 }
  0x35   :  { %719 = dma.done.wait [#allocation10], 768  }
  0x36   :  { %720 = vsyncadd [#allocation10], 4294966528  ;;  %vm73_vm0 = vcmask 523264   ;;  %vm75_vm1 = vcmask 261120   ;;  %v732_v0 = vmov 0.0   ;;  %s846_s13 = smov 0  }
  0x37   :  { %74 = vst.msk [vmem:[#allocation2] sm:$0xff] %vm73_vm0, %v732_v0  ;;  %v839_v1 = vld [vmem:[%s904_s2] ss:$0 sm:$0xff] }
  0x38   :  { %76 = vst.msk [vmem:[#allocation3] sm:$0xff] %vm75_vm1, %v732_v0  ;;  %77 = vst.msk [vmem:[#allocation4] sm:$0xff] %vm75_vm1, %v732_v0  ;;  %v844_v2 = vld [vmem:[%s906_s4] ss:$0 sm:$0xff] }
  0x39 LB: > { %v597_v3 = vld [vmem:[#allocation9] sm:$0xff]   ;;  %v733_v4 = vmov 0.0   ;;  %v598_v5 = vld [vmem:[#allocation9 + $0x8] sm:$0xff]   ;;  %vm734_vm2 = vmmov 0   ;;  %s498_s2 = sshll.u32 %s725_s13, 2  ;;  %s735_s14 = smov 64   ;;  %s725_s13 = sphi %s846_s13, %s85_s13  }
  0x3a   : > { %539 = vmatprep.subr.bf16.mxu0 %v733_v4  ;;  %547 = vmatprep.subr.bf16.mxu1 %v733_v4  ;;  %s87_s4 = scalar_lea.vmem [#allocation6], %s498_s2  ;;  %s736_s19 = smov 32   ;;  %v599_v28 = vld [vmem:[#allocation11] sm:$0xff]   ;;  %v600_v29 = vld [vmem:[#allocation11 + $0x8] sm:$0xff]   ;;  %v601_v31 = vld [vmem:[#allocation11 + $0x10] sm:$0xff]   ;;  %vm321_vm3 = vcmask 523520  }
  0x3b   : > { %540 = vmatpush3.bf16.msra.mxu0 %v597_v3  ;;  %543 = vmatprep.mubr.msk.bf16.mxu0 %vm734_vm2, %v733_v4  ;;  %v88_v8 = vld [vmem:[%s87_s4] sm:$0xf]  ;;  %s737_s20 = smov 96   ;;  %vm332_vm4 = vcmask 257024   ;;  %s331_s21 = scalar_lea.vmem [#allocation5], %s498_s2 }
  0x3c   : > { %541 = vmatprep.subr.bf16.mxu0 %v733_v4  ;;  %555 = vmatprep.mubr.msk.bf16.mxu1 %vm734_vm2, %v733_v4  ;;  %v89_v9 = vunpack.c.l.bf16 %v88_v8  ;;  %v602_v32 = vld [vmem:[#allocation11 + $0x18] sm:$0xff]   ;;  %s85_s13 = sadd.s32 1, %s725_s13  }
  0x3d   : > { %548 = vmatpush3.bf16.msra.mxu1 %v599_v28  ;;  %p82_p10 = scmp.ge.s32.totalorder %s85_s13, 8  }
  0x3e   : > { %v90_v6 = vld [vmem:[#allocation2] sm:$0xff]  ;;  %549 = vmatprep.subr.bf16.mxu1 %v733_v4  ;;  %v620_v0 = vld [vmem:[%s907_s5 + $0x8] sm:$0xff] (%p82_p10)   ;;  %s738_s26 = smov (%p82_p10), [#allocation12]  }
  0x3f   : > { %v91_v7 = vpack.c.bf16 %v90_v6, %v90_v6  ;;  %542 = vmatpush3.bf16.msra.mxu0 %v598_v5  ;;  %v160_v17 = vld [vmem:[#allocation3] sm:$0xff]  ;;  %v283_v35 = vld [vmem:[#allocation4] sm:$0xff]  ;;  %v619_v63 = vld [vmem:[%s907_s5] sm:$0xff] (%p82_p10)   ;;  %s476_s28 = sshll.u32 (%p82_p10), %s738_s26, 4  ;;  %s477_s28 = int_to_ptr.vmem [resolvable:$true] %s476_s28 }
  0x40   :  { %559 = vmatprep.subr.bf16.mxu0 (%p82_p10), %v619_v63  ;;  %v513_v5 = vld [vmem:[%s908_s6] ss:$0 sm:$0xff] (%p82_p10)  ;;  %s691_s6 = scalar_lea.vmem (%p82_p10), %s477_s28, 1024  ;;  %p696_p12 = scmp.lt.s32.totalorder (%p82_p10), %s477_s28, %s477_s28 }
  0x41   : > { %550 = vmatpush3.bf16.msra.mxu1 %v600_v29  ;;  %p692_p11 = scmp.ne.s32.totalorder (%p82_p10), %s477_s28, %s691_s6  ;;  %p697_p13 = scmp.lt.s32.totalorder (%p82_p10), %s691_s6, %s691_s6 }
  0x42   : > { %544 = vmatmul.mubr.msk.bf16.vlgmr.msra.gmra.mrb[0].mxu0 %vm75_vm1, %v91_v7  ;;  %551 = vmatprep.subr.bf16.mxu1 %v733_v4 }
  0x43   :  { %560 = vmatpush3.bf16.msra.mxu0 (%p82_p10), %v619_v63  ;;  %p698_p0 = por (%p82_p10), %p697_p13, %p696_p12 }
  0x44   :  { %561 = vmatprep.subr.bf16.mxu0 (%p82_p10), %v620_v0 }
  0x45   : > { %552 = vmatpush3.bf16.msra.mxu1 %v601_v31  ;;  %p699_p1 = pnand (%p82_p10), %p698_p0, %p692_p11 }
  0x46   : > { %553 = vmatprep.subr.bf16.mxu1 %v733_v4 }
  0x47   :  { %562 = vmatpush3.bf16.msra.mxu0 (%p82_p10), %v620_v0 }
  0x49   : > { %554 = vmatpush3.bf16.msra.mxu1 %v602_v32 }
  0x4a   :  { %571 = vmatprep.subr.bf16.mxu1 (%p82_p10), %v619_v63 }
 0x115   : > { %v146_v10 = vpop.f32.mrb[0].mxu0 }
 0x116   : > { %v152_v11 = vadd.f32 %v146_v10, %v89_v9  ;;  %v545_v12 = vpop.f32.mrb[1].mxu0 }
 0x117   : > { %v149_v13 = vpop.f32.mrb[2].mxu0 }
 0x118   : > { %v159_v14 = vadd.f32 %v839_v1, %v152_v11  ;;  %v546_v15 = vpop.f32.mrb[3].mxu0 }
 0x11a   : > { %603 = vtanh.f32 %v159_v14  ;;  %v503_v18 = vmul.f32 -1.442695, %v159_v14 }
 0x11c   : > { %605 = vpow2.f32 %v503_v18 }
 0x124   : > { %v604_v16 = vpop.eup %603 }
 0x125   : > { %174 = vrot.lane.b32.xlu0 %v604_v16, %s735_s14 }
 0x126   : > { %v606_v19 = vpop.eup %605 }
 0x127   : > { %v164_v20 = vadd.f32 1.0, %v606_v19 }
 0x129   : > { %169 = vrot.lane.b32.xlu0 %v160_v17, %s736_s19  ;;  %607 = vrcp.f32 %v164_v20 }
 0x133   : > { %v608_v21 = vpop.eup %607 }
 0x197   : > { %v175_v22 = vpop.permute.xlu0 %174 }
 0x198   : > { %v177_v23 = vmul.f32 %v608_v21, %v175_v22 }
 0x19a   : > { %179 = vrot.lane.b32.xlu1 %v177_v23, %s736_s19 }
 0x19b   : > { %v170_v24 = vpop.permute.xlu0 %169 }
 0x19c   : > { %v172_v25 = vmul.f32 %v608_v21, %v170_v24 }
 0x20c   : > { %v180_v26 = vpop.permute.xlu1 %179 }
 0x20d   : > { %v182_v27 = vadd.f32 %v180_v26, %v172_v25 }
 0x20f   : > { %609 = vtanh.f32 %v182_v27 }
 0x219   : > { %v610_v30 = vpop.eup %609 }
 0x21a   : > { %185 = vrot.lane.b32.xlu1 %v610_v30, %s735_s14 }
 0x28c   : > { %v186_v33 = vpop.permute.xlu1 %185 }
 0x28d   : > { %v188_v34 = vmul.f32 %v608_v21, %v186_v33 }
 0x28f   : > { %195 = vrot.lane.b32.xlu0 %v188_v34, %s736_s19 }
 0x293   : > { %292 = vrot.lane.b32.xlu0 %v283_v35, %s736_s19 }
 0x301   : > { %v196_v36 = vpop.permute.xlu0 %195 }
 0x302   : > { %198 = vst.msk [vmem:[#allocation2] sm:$0xff] %vm75_vm1, %v196_v36 }
 0x305   : > { %v293_v51 = vpop.permute.xlu0 %292 }
 0x309   : > { %v199_v37 = vld [vmem:[#allocation2] sm:$0xff] }
 0x30a   : > { %v200_v38 = vpack.c.bf16 %v199_v37, %v199_v37 }
 0x30c   : > { %556 = vmatmul.mubr.msk.bf16.vlgmr.msra.gmra.mrb[0].mxu1 %vm73_vm0, %v200_v38 }
 0x30d   :  { %573 = vmatpush3.bf16.msra.mxu1 (%p82_p10), %v619_v63 }
 0x30e   :  { %572 = vmatprep.subr.bf16.mxu1 (%p82_p10), %v620_v0 }
 0x311   :  { %574 = vmatpush3.bf16.msra.mxu1 (%p82_p10), %v620_v0 }
 0x3df   : > { %v277_v39 = vpop.f32.mrb[0].mxu1 }
 0x3e0   : > { %v278_v40 = vadd.f32 %v844_v2, %v277_v39  ;;  %v557_v41 = vpop.f32.mrb[1].mxu1 }
 0x3e1   : > { %v280_v42 = vpop.f32.mrb[2].mxu1 }
 0x3e2   : > { %611 = vtanh.f32 %v278_v40  ;;  %v558_v43 = vpop.f32.mrb[3].mxu1  ;;  %v510_v45 = vmul.f32 -1.442695, %v278_v40 }
 0x3e4   : > { %613 = vpow2.f32 %v510_v45 }
 0x3ec   : > { %v612_v44 = vpop.eup %611 }
 0x3ed   : > { %297 = vrot.lane.b32.xlu1 %v612_v44, %s735_s14 }
 0x3ee   : > { %v614_v46 = vpop.eup %613 }
 0x3ef   : > { %v287_v47 = vadd.f32 1.0, %v614_v46 }
 0x3f1   : > { %615 = vrcp.f32 %v287_v47 }
 0x3fb   : > { %v616_v48 = vpop.eup %615 }
 0x3fc   : > { %v295_v52 = vmul.f32 %v616_v48, %v293_v51 }
 0x45f   : > { %v298_v49 = vpop.permute.xlu1 %297 }
 0x460   : > { %v300_v50 = vmul.f32 %v616_v48, %v298_v49 }
 0x462   : > { %302 = vrot.lane.b32.xlu1 %v300_v50, %s736_s19 }
 0x466   : > { %190 = vrot.lane.b32.xlu1 %v182_v27, %s737_s20 }
 0x4d4   : > { %v303_v53 = vpop.permute.xlu1 %302 }
 0x4d5   : > { %v305_v54 = vadd.f32 %v303_v53, %v295_v52 }
 0x4d7   : > { %617 = vtanh.f32 %v305_v54 }
 0x4d8   : > { %v191_v55 = vpop.permute.xlu1 %190 }
 0x4d9   : > { %193 = vst.msk [vmem:[#allocation3] sm:$0xff] %vm75_vm1, %v191_v55 }
 0x4e1   : > { %v618_v56 = vpop.eup %617 }
 0x4e2   : > { %308 = vrot.lane.b32.xlu0 %v618_v56, %s735_s14 }
 0x4e6   : > { %313 = vrot.lane.b32.xlu0 %v305_v54, %s737_s20 }
 0x554   : > { %v309_v57 = vpop.permute.xlu0 %308 }
 0x555   : > { %v311_v58 = vmul.f32 %v616_v48, %v309_v57 }
 0x557   : > { %v524_v59 = vpack.c.bf16 %v311_v58, %v311_v58  ;;  %318 = vrot.lane.b32.xlu1 %v311_v58, %s735_s14 }
 0x558   : > { %v314_v60 = vpop.permute.xlu0 %313 }
 0x559   : > { %316 = vst.msk [vmem:[#allocation4] sm:$0xff] %vm75_vm1, %v314_v60  ;;  %327 = vrot.lane.b32.xlu0 %v524_v59, %s736_s19 }
 0x5c6   :  { %84 = sbr.rel (!%p82_p10) target bundleno = 57 (0x39), region = 73 }
 0x5c9   : > { %v319_v61 = vpop.permute.xlu1 %318 }
 0x5ca   : > { %322 = vst.msk [vmem:[#allocation2] sm:$0xff] %vm321_vm3, %v319_v61 }
 0x5cb   : > { %v328_v62 = vpop.permute.xlu0 %327 }
 0x5cc   : > { %333 = vst.msk [vmem:[%s331_s21] sm:$0xf] %vm332_vm4, %v328_v62 }
 0x5d3   :  { %v621_v3 = vld [vmem:[#allocation5] sm:$0xff]   ;;  %v622_v4 = vld [vmem:[#allocation5 + $0x10] sm:$0xff]   ;;  %v623_v1 = vld [vmem:[#allocation5 + $0x8] sm:$0xff]  }
 0x5d4   :  { %563 = vmatprep.mubr.msk.bf16.mxu0 %vm75_vm1, %v621_v3  ;;  %567 = vmatprep.mubr.msk.bf16.mxu1 %vm75_vm1, %v622_v4  ;;  %v624_v2 = vld [vmem:[#allocation5 + $0x18] sm:$0xff]  }
 0x5d5   :  { %564 = vmatmul.mubr.msk.bf16.vlgmr.msra.gmra.mrb[0].mxu0 %vm75_vm1, %v623_v1  ;;  %568 = vmatmul.mubr.msk.bf16.vlgmr.msra.gmra.mrb[0].mxu1 %vm75_vm1, %v624_v2 }
 0x6a8   :  { %v565_v6 = vpop.f32.mrb[0].mxu0  ;;  %v569_v7 = vpop.f32.mrb[0].mxu1 }
 0x6a9   :  { %v441_v8 = vadd.f32 %v565_v6, %v513_v5  ;;  %v457_v9 = vadd.f32 %v569_v7, %v513_v5  ;;  %v432_v10 = vpop.f32.mrb[1].mxu0  ;;  %v448_v11 = vpop.f32.mrb[1].mxu1 }
 0x6aa   :  { %v433_v12 = vadd.f32 %v513_v5, %v432_v10  ;;  %v449_v13 = vadd.f32 %v513_v5, %v448_v11  ;;  %v566_v14 = vpop.f32.mrb[2].mxu0  ;;  %v570_v15 = vpop.f32.mrb[2].mxu1 }
 0x6ab   :  { %465 = vst [vmem:[#allocation12 + $0x10] sm:$0xff] %v441_v8  ;;  %469 = vst [vmem:[#allocation12 + $0x30] sm:$0xff] %v457_v9  ;;  %v444_v16 = vadd.f32 %v566_v14, %v513_v5  ;;  %v460_v17 = vadd.f32 %v570_v15, %v513_v5  ;;  %v435_v18 = vpop.f32.mrb[3].mxu0  ;;  %v451_v19 = vpop.f32.mrb[3].mxu1 }
 0x6ac   :  { %463 = vst [vmem:[#allocation12] sm:$0xff] %v433_v12  ;;  %467 = vst [vmem:[#allocation12 + $0x20] sm:$0xff] %v449_v13  ;;  %v436_v20 = vadd.f32 %v513_v5, %v435_v18  ;;  %v452_v21 = vadd.f32 %v513_v5, %v451_v19 }
 0x6ad   :  { %466 = vst [vmem:[#allocation12 + $0x18] sm:$0xff] %v444_v16  ;;  %470 = vst [vmem:[#allocation12 + $0x38] sm:$0xff] %v460_v17 }
 0x6ae   :  { %464 = vst [vmem:[#allocation12 + $0x8] sm:$0xff] %v436_v20  ;;  %468 = vst [vmem:[#allocation12 + $0x28] sm:$0xff] %v452_v21 }
 0x6af   :  { %702 = shalt.err (!%p699_p1)
}
 0x6b0   :  { %s703_s8 = scalar_lea.hbm %s909_s7, 1024 }
 0x6b1   :  { %p704_p2 = scmp.ne.s32.totalorder %s909_s7, %s703_s8  ;;  %p707_p3 = scmp.lt.u32.totalorder %s703_s8, %s909_s7 }
 0x6b3   :  { %p709_p4 = pnand %p707_p3, %p704_p2 }
 0x6b5   :  { %712 = shalt.err (!%p709_p4)
}
 0x6b6   :  { %s739_s15 = smov 128   ;;  %s740_s0 = smov 8  }
 0x6b7   :  { %482 = dma.vmem_to_hbm [thread:$0]  %s477_s28, 1024, %s909_s7, [#allocation8], %s739_s15, %s739_s15, %s740_s0  }
 0x6b8   :  { %721 = dma.done.wait [#allocation8], 1024  }
 0x6b9   :  { %722 = vsyncadd [#allocation8], 4294966272 }
 0x6ba   :  { %486 = vsyncpa [#allocation7], 1 }
 0x6bb   :  { %487 = vsyncpa [#allocation10], 1 }
 0x6bc   :  { %488 = vsyncpa [#allocation8], 1 }

</bundles_post_ra>
